<compile_context>
chip_gen: v6e
topology: v6e:2x2x1
jax: 0.10.0
libtpu: 0.0.40
codegen_flags: <defaults>
</compile_context>

<pallas_src>
import jax
import jax.numpy as jnp
from jax.experimental import pallas as pl
from jax.experimental.pallas import tpu as pltpu


def _double_kernel(x_ref, o_ref):
    # Hot path: elementwise x + x on the VPU (stays in the input dtype;
    # no extra casts so bf16 on v5e does not pick up widening work).
    v = x_ref[...]
    o_ref[...] = v + v


_TILE_ROWS = 512          # rows per tile for the tiled path (multiple of 8)
_TILE_LANES_MAX = 1024    # lane width cap: (512, 1024) f32 tile = 2 MiB
_SMALL_BYTES = 4 << 20    # below this, a single grid-less call is fastest


def _lane_dense_slab(total):
    """Widest lane-dense 2D factorization (rows, lanes), lanes % 128 == 0."""
    for lanes in (1024, 512, 256, 128):
        if total % lanes == 0:
            return total // lanes, lanes
    return None


def _whole_array_call(arr):
    """Grid-less pallas_call: whole array lives in VMEM, no pipelining."""
    return pl.pallas_call(
        _double_kernel,
        out_shape=jax.ShapeDtypeStruct(arr.shape, arr.dtype),
        in_specs=[pl.BlockSpec(memory_space=pltpu.VMEM)],
        out_specs=pl.BlockSpec(memory_space=pltpu.VMEM),
    )(arr)


def aten_cuda_module_forward(x):
    """Pallas equivalent of AtenCudaModule.forward: returns x + x."""
    orig_shape = x.shape
    total = x.size
    nbytes = total * jnp.dtype(x.dtype).itemsize

    slab = _lane_dense_slab(total)
    if slab is None:
        # Element count not a multiple of 128: run whole-array in VMEM on the
        # original shape (block == full array, so no tiling constraints).
        return _whole_array_call(x)

    rows, lanes = slab
    x2d = x.reshape(rows, lanes)

    if nbytes > _SMALL_BYTES and rows % _TILE_ROWS == 0:
        # Large input: tiled, pipelined, and parallel across TensorCores.
        out2d = pl.pallas_call(
            _double_kernel,
            out_shape=jax.ShapeDtypeStruct((rows, lanes), x.dtype),
            grid=(rows // _TILE_ROWS,),
            in_specs=[pl.BlockSpec((_TILE_ROWS, lanes), lambda i: (i, 0))],
            out_specs=pl.BlockSpec((_TILE_ROWS, lanes), lambda i: (i, 0)),
            compiler_params=pltpu.CompilerParams(
                dimension_semantics=("parallel",)),
        )(x2d)
    else:
        # Small input (the test shape lands here): grid-less, whole slab in
        # VMEM, lane-dense output (lanes = widest multiple of 128 that fits).
        out2d = _whole_array_call(x2d)

    return out2d.reshape(orig_shape)


if __name__ == "__main__":
    key = jax.random.PRNGKey(0)
    # Small NCHW input consistent with the module: (N=2, C=4, H=16, W=16)
    x = jax.random.normal(key, (2, 4, 16, 16), dtype=jnp.float32)

    out = aten_cuda_module_forward(x)
    out = jax.block_until_ready(out)

    expected = x + x
    assert out.shape == x.shape
    assert out.dtype == x.dtype
    assert jnp.allclose(out, expected), "mismatch vs reference x + x"

    print("KERNEL_OK")
</pallas_src>

<mosaic_0001>
module attributes {stable_mosaic.version = 11 : i64} {
  func.func @_double_kernel(%arg0: memref<2x1024xf32, #tpu.memory_space<vmem>>, %arg1: memref<2x1024xf32, #tpu.memory_space<vmem>>) attributes {dimension_semantics = [], scalar_prefetch = 0 : i64, scratch_operands = 0 : i64, tpu.core_type = #tpu.core_type<tc>} {
    %c0 = arith.constant 0 : index
    %c0_0 = arith.constant 0 : index
    %0 = vector.load %arg0[%c0, %c0_0] : memref<2x1024xf32, #tpu.memory_space<vmem>>, vector<2x1024xf32>
    %1 = arith.addf %0, %0 : vector<2x1024xf32>
    %c0_1 = arith.constant 0 : index
    %c0_2 = arith.constant 0 : index
    %2 = vector.load %arg1[%c0_1, %c0_2] : memref<2x1024xf32, #tpu.memory_space<vmem>>, vector<2x1024xf32>
    tpu.vector_store %arg1[%c0_1, %c0_2], %1 {strides = array<i32>} : memref<2x1024xf32, #tpu.memory_space<vmem>>, vector<2x1024xf32>,
    return
  }
}

</mosaic_0001>

<bundles_post_ra>
// kernel: tpu_custom_call.1
= control target key start
LH: loop header
LB: loop body
LE: loop exit
PB: predicated region body
PF: predicated region fallthrough
CT: control target
= control target key end

     0   :  { %6 = vsyncpa [#allocation3], 0  ;;  %s106_s0 = inlined_call_operand.hbm [shape: f32[2,1024], index: 0, kind: input, shape index: {}]   ;;  %s107_s1 = inlined_call_operand.hbm [shape: f32[2,1024], index: 1, kind: output, shape index: {}]  }
   0x1   :  { %7 = vsyncpa [#allocation4], 0  ;;  %s88_s6 = smov [#allocation2]  }
   0x2   :  { %s14_s7 = sshll.u32 %s88_s6, 4  ;;  %s15_s7 = int_to_ptr.vmem [resolvable:$true] %s14_s7 }
   0x3   :  { %s52_s8 = scalar_lea.vmem %s15_s7, 256  ;;  %p57_p1 = scmp.lt.s32.totalorder %s15_s7, %s15_s7 }
   0x4   :  { %p53_p0 = scmp.ne.s32.totalorder %s15_s7, %s52_s8  ;;  %p58_p2 = scmp.lt.s32.totalorder %s52_s8, %s52_s8 }
   0x6   :  { %p59_p3 = por %p58_p2, %p57_p1 }
   0x8   :  { %p60_p4 = pnand %p59_p3, %p53_p0 }
   0xa   :  { %63 = shalt.err (!%p60_p4)
}
   0xb   :  { %17 = dma.hbm_to_vmem [thread:$0]  %s106_s0, 256, %s15_s7, [#allocation3]  }
   0xc   :  { %84 = dma.done.wait [#allocation3], 256  }
   0xd   :  { %85 = vsyncadd [#allocation3], 4294967040  ;;  %s89_s11 = smov [#allocation5]   ;;  %v21_v0 = vld [vmem:[#allocation2] sm:$0xff]  ;;  %v22_v1 = vld [vmem:[#allocation2 + $0x8] sm:$0xff] }
   0xe   :  { %s33_s12 = sshll.u32 %s89_s11, 4  ;;  %v23_v2 = vadd.f32 %v21_v0, %v21_v0  ;;  %v24_v3 = vadd.f32 %v22_v1, %v22_v1  ;;  %s34_s12 = int_to_ptr.vmem [resolvable:$true] %s33_s12 }
   0xf   :  { %s64_s13 = scalar_lea.vmem %s34_s12, 256  ;;  %p69_p6 = scmp.lt.s32.totalorder %s34_s12, %s34_s12 }
  0x10   :  { %25 = vst [vmem:[#allocation5] sm:$0xff] %v23_v2  ;;  %26 = vst [vmem:[#allocation5 + $0x8] sm:$0xff] %v24_v3  ;;  %p65_p5 = scmp.ne.s32.totalorder %s34_s12, %s64_s13  ;;  %p70_p7 = scmp.lt.s32.totalorder %s64_s13, %s64_s13 }
  0x12   :  { %p71_p8 = por %p70_p7, %p69_p6 }
  0x14   :  { %p72_p9 = pnand %p71_p8, %p65_p5 }
  0x16   :  { %75 = shalt.err (!%p72_p9)
}
  0x17   :  { %36 = dma.vmem_to_hbm [thread:$0]  %s34_s12, 256, %s107_s1, [#allocation4]  }
  0x18   :  { %86 = dma.done.wait [#allocation4], 256  }
  0x19   :  { %87 = vsyncadd [#allocation4], 4294967040 }
  0x1a   :  { %40 = vsyncpa [#allocation3], 1 }
  0x1b   :  { %41 = vsyncpa [#allocation4], 1 }

</bundles_post_ra>
